<compile_context>
chip_gen: v7x
topology: tpu7x:2x2x1
jax: 0.10.0
libtpu: 0.0.40
codegen_flags: <defaults>
</compile_context>

<pallas_src>
import jax
import jax.numpy as jnp
from jax.experimental import pallas as pl
from jax.experimental.pallas import tpu as pltpu


def _round_up(x, m):
    return ((x + m - 1) // m) * m


def _divisors(n):
    return [d for d in range(1, n + 1) if n % d == 0]


def _vmem_capacity_bytes():
    try:
        cap = int(pltpu.get_tpu_info().vmem_capacity_bytes)
        if cap > 0:
            return min(cap, 128 * 1024 * 1024)
    except Exception:
        pass
    return 64 * 1024 * 1024          # v7x per-TC VMEM: safe lower bound


# ----------------------------------------------------------------------------
# Kernel 1: transposed-conv (phase-decomposed) as tap-accumulated matmuls,
#           plus per-band partial sums / sums-of-squares of the pre-bias
#           result z for BatchNorm batch statistics (f32 accumulation).
# Grid: (bands, 3);  innermost axis = row shift dh ("arbitrary"); the 3
# column shifts dw are unrolled in-kernel with static slices.
# ----------------------------------------------------------------------------
def _convt_stats_kernel(x_ref, w_ref, y_ref, sum_ref, sumsq_ref, acc_ref):
    # x_ref:   (nb, H+2, W+2, Cin)  bf16 halo'd NHWC band (resident across dh)
    # w_ref:   (1, 3, Cin, 4*Cp)    bf16 weights for this dh, all 3 dw shifts
    # y_ref:   (nb*H*W, 4*Cp)       bf16 pre-bias conv result z
    # acc_ref: (nb*H*W, 4*Cp)       f32 accumulator (scratch, persists over dh)
    dh = pl.program_id(1)
    nb, hp2, wp2, cin = x_ref.shape
    h, w = hp2 - 2, wp2 - 2
    rows = nb * h * w

    @pl.when(dh == 0)
    def _():
        acc_ref[...] = jnp.zeros_like(acc_ref)

    contrib = None
    for dw in range(3):                                     # static sublane shifts
        xt = x_ref[:, pl.ds(dh, h), pl.ds(dw, w), :].reshape(rows, cin)
        part = jnp.dot(xt, w_ref[0, dw], preferred_element_type=jnp.float32)
        contrib = part if contrib is None else contrib + part
    acc_ref[...] += contrib

    @pl.when(dh == pl.num_programs(1) - 1)
    def _():
        z = acc_ref[...]
        y_ref[...] = z.astype(y_ref.dtype)
        sum_ref[...] = jnp.sum(z, axis=0, keepdims=True)[None]        # (1, 1, C4)
        sumsq_ref[...] = jnp.sum(z * z, axis=0, keepdims=True)[None]  # (1, 1, C4)


# ----------------------------------------------------------------------------
# Kernel 2: BatchNorm affine (precomputed scale / bias) + ReLU, in place.
# ----------------------------------------------------------------------------
def _bn_relu_kernel(z_ref, scale_ref, bias_ref, o_ref):
    z = z_ref[...].astype(jnp.float32)
    o_ref[...] = jnp.maximum(z * scale_ref[...] + bias_ref[...], 0.0).astype(o_ref.dtype)


def transpose_block_forward(x, b_unused_see_note=None, *args, **kwargs):
    raise NotImplementedError  # placeholder overwritten below (keeps linters quiet)


def transpose_block_forward(x, w, b, gamma, beta, *, eps=1e-5):
    """x: (N, Cin, H, W); w: (Cin, Cout, 4, 4) (PyTorch ConvTranspose2d layout)."""
    N, Cin, H, W = x.shape
    _, Cout, KH, KW = w.shape
    assert (KH, KW) == (4, 4), "stride-phase decomposition assumes k=4, s=2, p=1"
    OH, OW = 2 * H, 2 * W

    compute_dt = jnp.bfloat16
    # Lane-dense channel padding; multiple of 256 lanes (v6e/v7x MXU width)
    # once Cout > 32, minimum 128 lanes for tiny Cout (memory-bound anyway).
    Cp = 32 if Cout <= 32 else _round_up(Cout, 64)
    C4 = 4 * Cp
    M = N * H * W
    rows_img = H * W

    vmem_cap = _vmem_capacity_bytes()
    budget = int(vmem_cap * 0.55)

    # ---- choose nb = images per band (kernel-1 matmul row tile = nb*H*W) ----
    fixed = 2 * 3 * Cin * C4 * 2 + 8 * C4 * 4          # dbl-buffered weights + stats

    def band_bytes(nb_):
        rows = nb_ * rows_img
        return (fixed
                + 2 * nb_ * (H + 2) * (W + 2) * Cin * 2     # halo'd x band (dbl-buf)
                + rows * C4 * 4                             # f32 accumulator
                + 2 * rows * C4 * 2)                        # z output block (dbl-buf)

    nb_cap = N if N == 1 else max(1, N // 2)    # keep >=2 parallel steps (v7x megacore)
    nb = None
    for d in _divisors(N):
        if d > nb_cap:
            break
        if (d * rows_img) % 8 != 0 and d != N:
            continue
        if d * rows_img > 8192 or band_bytes(d) > budget:
            break
        nb = d
    if nb is None:
        # smallest sublane-aligned divisor; may exceed the soft budget for huge images.
        nb = next((d for d in _divisors(N) if (d * rows_img) % 8 == 0), N)
    num_bands = N // nb
    rows_band = nb * rows_img
    est1 = band_bytes(nb)

    # ---- kernel-2 (BN+ReLU) row tile: whole bands, byte-budgeted ------------
    f = 1
    f_cap = num_bands if num_bands == 1 else max(1, num_bands // 2)
    for d in _divisors(num_bands):
        if d > f_cap:
            break
        if 4 * d * rows_band * C4 * 2 + 4 * C4 * 4 > budget or d * rows_band > 32768:
            break
        f = d
    tm2 = f * rows_band
    grid2 = num_bands // f
    est2 = 4 * tm2 * C4 * 2 + 4 * C4 * 4

    vmem_limit = int(min(max(max(est1, est2) * 1.3 + (4 << 20), 24 << 20),
                         vmem_cap - (4 << 20)))
    cparams1 = pltpu.CompilerParams(
        dimension_semantics=("parallel", "arbitrary"),
        vmem_limit_bytes=vmem_limit)
    cparams2 = pltpu.CompilerParams(
        dimension_semantics=("parallel",),
        vmem_limit_bytes=vmem_limit)

    # ---- inputs for kernel 1: once-padded NHWC input, phase-expanded weights
    x_pad = jnp.pad(jnp.transpose(x, (0, 2, 3, 1)),
                    ((0, 0), (1, 1), (1, 1), (0, 0))).astype(compute_dt)

    # z[n, h, w, (ph*2+pw)*Cp + co] =
    #   sum_{dh,dw,ci} x_pad[n, h+dh, w+dw, ci] * Wt[dh, dw, ci, p, co]
    # with Wt[dh,dw,ci,p,co] = w[ci, co, 3+ph-2dh, 3+pw-2dw] for dh in {ph,ph+1},
    # dw in {pw,pw+1}, else 0   (k=4, s=2, p=1 stride-phase decomposition).
    w_f32 = w.astype(jnp.float32)
    Wt = jnp.zeros((3, 3, Cin, 4, Cp), jnp.float32)
    for ph in range(2):
        for pw_ in range(2):
            p = ph * 2 + pw_
            for dh in (ph, ph + 1):
                for dw in (pw_, pw_ + 1):
                    kh, kw = 3 + ph - 2 * dh, 3 + pw_ - 2 * dw
                    Wt = Wt.at[dh, dw, :, p, :Cout].set(w_f32[:, :, kh, kw])
    Wt = Wt.reshape(3, 3, Cin, C4).astype(compute_dt)

    z_flat, sum_part, sumsq_part = pl.pallas_call(
        _convt_stats_kernel,
        out_shape=(jax.ShapeDtypeStruct((M, C4), compute_dt),
                   jax.ShapeDtypeStruct((num_bands, 1, C4), jnp.float32),
                   jax.ShapeDtypeStruct((num_bands, 1, C4), jnp.float32)),
        grid=(num_bands, 3),
        in_specs=[pl.BlockSpec((nb, H + 2, W + 2, Cin), lambda bi, dh: (bi, 0, 0, 0)),
                  pl.BlockSpec((1, 3, Cin, C4), lambda bi, dh: (dh, 0, 0, 0))],
        out_specs=(pl.BlockSpec((rows_band, C4), lambda bi, dh: (bi, 0)),
                   pl.BlockSpec((1, 1, C4), lambda bi, dh: (bi, 0, 0)),
                   pl.BlockSpec((1, 1, C4), lambda bi, dh: (bi, 0, 0))),
        scratch_shapes=[pltpu.VMEM((rows_band, C4), jnp.float32)],
        compiler_params=cparams1,
    )(x_pad, Wt)

    # ---- BatchNorm batch statistics (training mode, biased variance) --------
    cnt = jnp.float32(4 * M)                               # = N * OH * OW per channel
    sum_z = jnp.sum(sum_part[:, 0, :], axis=0).reshape(4, Cp).sum(axis=0)     # (Cp,)
    sumsq_z = jnp.sum(sumsq_part[:, 0, :], axis=0).reshape(4, Cp).sum(axis=0)
    mean_z = sum_z / cnt
    var = jnp.maximum(sumsq_z / cnt - mean_z * mean_z, 0.0)

    gamma_pad = jnp.zeros((Cp,), jnp.float32).at[:Cout].set(gamma.astype(jnp.float32))
    beta_pad = jnp.zeros((Cp,), jnp.float32).at[:Cout].set(beta.astype(jnp.float32))
    # ConvTranspose2d bias only shifts the channel mean, so it cancels exactly in
    # training-mode BatchNorm:  scale*((z+b) - (mean_z+b)) == scale*(z - mean_z).
    _ = b
    scale = gamma_pad * jax.lax.rsqrt(var + eps)
    bias_bn = beta_pad - mean_z * scale
    scale_mat = jnp.tile(scale, 4)[None]                   # (1, 4*Cp) f32
    bias_mat = jnp.tile(bias_bn, 4)[None]

    # ---- fused BN affine + ReLU, in place on the conv intermediate ----------
    out_flat = pl.pallas_call(
        _bn_relu_kernel,
        out_shape=jax.ShapeDtypeStruct((M, C4), compute_dt),
        grid=(grid2,),
        in_specs=[pl.BlockSpec((tm2, C4), lambda i: (i, 0)),
                  pl.BlockSpec((1, C4), lambda i: (0, 0)),
                  pl.BlockSpec((1, C4), lambda i: (0, 0))],
        out_specs=pl.BlockSpec((tm2, C4), lambda i: (i, 0)),
        input_output_aliases={0: 0},
        compiler_params=cparams2,
    )(z_flat, scale_mat, bias_mat)

    # ---- interleave the 4 stride phases, strip channel pad, to NCHW ---------
    # One XLA transpose does both the phase interleave and NHWC->NCHW; emitting
    # NHWC from kernel 2 would still require the same NHWC->NCHW pass.
    y = out_flat.reshape(N, H, W, 2, 2, Cp)                # (..., ph, pw, Cp)
    y = jnp.transpose(y, (0, 5, 1, 3, 2, 4)).reshape(N, Cp, OH, OW)
    return y[:, :Cout].astype(jnp.float32)


# ----------------------------------------------------------------------------
# Pure-JAX f32 reference (sanity check of the whole forward pass).
# ----------------------------------------------------------------------------
def reference_forward(x, w, b, gamma, beta, *, stride=2, padding=1, eps=1e-5):
    KH = w.shape[2]
    w_conv = jnp.transpose(w[:, :, ::-1, ::-1], (1, 0, 2, 3))  # (Cout, Cin, KH, KW)
    pb = KH - 1 - padding
    y = jax.lax.conv_general_dilated(
        x, w_conv, window_strides=(1, 1), padding=[(pb, pb), (pb, pb)],
        lhs_dilation=(stride, stride),
        dimension_numbers=('NCHW', 'OIHW', 'NCHW'))
    y = y + b.reshape(1, -1, 1, 1)
    mean = y.mean(axis=(0, 2, 3), keepdims=True)
    var = y.var(axis=(0, 2, 3), keepdims=True)          # biased, like PyTorch BN norm
    y = (y - mean) / jnp.sqrt(var + eps) * gamma.reshape(1, -1, 1, 1) \
        + beta.reshape(1, -1, 1, 1)
    return jnp.maximum(y, 0.0)


if __name__ == "__main__":
    key = jax.random.PRNGKey(0)
    kx, kw, kb, kg, kbt = jax.random.split(key, 5)

    N, Cin, Cout, H, W, KH = 2, 4, 8, 16, 16, 4
    x = jax.random.normal(kx, (N, Cin, H, W), dtype=jnp.float32)
    w = 0.1 * jax.random.normal(kw, (Cin, Cout, KH, KH), dtype=jnp.float32)
    b = 0.1 * jax.random.normal(kb, (Cout,), dtype=jnp.float32)
    gamma = 1.0 + 0.1 * jax.random.normal(kg, (Cout,), dtype=jnp.float32)
    beta = 0.1 * jax.random.normal(kbt, (Cout,), dtype=jnp.float32)

    fwd = jax.jit(transpose_block_forward)
    out = jax.block_until_ready(fwd(x, w, b, gamma, beta))

    ref = jax.block_until_ready(reference_forward(x, w, b, gamma, beta))
    assert out.shape == (N, Cout, 2 * H, 2 * W), out.shape
    max_err = float(jnp.max(jnp.abs(out - ref)))
    # bf16 matmul operands / bf16 intermediate -> looser tolerance than pure f32
    assert jnp.allclose(out, ref, atol=5e-2, rtol=5e-2), max_err

    print("KERNEL_OK")
</pallas_src>

<mosaic_0001>
module attributes {stable_mosaic.version = 11 : i64} {
  func.func @_convt_stats_kernel(%arg0: i32, %arg1: i32, %arg2: memref<1x18x18x4xbf16, #tpu.memory_space<vmem>>, %arg3: memref<1x3x4x128xbf16, #tpu.memory_space<vmem>>, %arg4: memref<256x128xbf16, #tpu.memory_space<vmem>>, %arg5: memref<1x1x128xf32, #tpu.memory_space<vmem>>, %arg6: memref<1x1x128xf32, #tpu.memory_space<vmem>>, %arg7: memref<256x128xf32, #tpu.memory_space<vmem>>) attributes {dimension_semantics = [#tpu.dimension_semantics<parallel>, #tpu.dimension_semantics<arbitrary>], iteration_bounds = array<i64: 2, 3>, scalar_prefetch = 0 : i64, scratch_operands = 1 : i64, tpu.core_type = #tpu.core_type<tc>, window_params = [{transform_indices = @transform_0, window_bounds = array<i64: 1, 18, 18, 4>}, {transform_indices = @transform_1, window_bounds = array<i64: 1, 3, 4, 128>}, {transform_indices = @transform_2, window_bounds = array<i64: 256, 128>}, {transform_indices = @transform_3, window_bounds = array<i64: 1, 1, 128>}, {transform_indices = @transform_4, window_bounds = array<i64: 1, 1, 128>}]} {
    %c0_i32 = arith.constant 0 : i32
    %0 = arith.cmpi eq, %arg1, %c0_i32 : i32
    %1 = arith.extui %0 : i1 to i32
    %c0_i32_0 = arith.constant 0 : i32
    %2 = arith.cmpi ne, %1, %c0_i32_0 : i32
    scf.if %2 {
      %cst_26 = arith.constant 0.000000e+00 : f32
      %29 = vector.broadcast %cst_26 : f32 to vector<256x128xf32>
      %c0_27 = arith.constant 0 : index
      %c0_28 = arith.constant 0 : index
      %30 = vector.load %arg7[%c0_27, %c0_28] : memref<256x128xf32, #tpu.memory_space<vmem>>, vector<256x128xf32>
      tpu.vector_store %arg7[%c0_27, %c0_28], %29 {strides = array<i32>} : memref<256x128xf32, #tpu.memory_space<vmem>>, vector<256x128xf32>,
    } else {
    }
    %c0 = arith.constant 0 : index
    %3 = arith.index_cast %arg1 : i32 to index
    %c0_1 = arith.constant 0 : index
    %c0_2 = arith.constant 0 : index
    %4 = vector.load %arg2[%c0, %3, %c0_1, %c0_2] : memref<1x18x18x4xbf16, #tpu.memory_space<vmem>>, vector<1x16x16x4xbf16>
    %5 = vector.shape_cast %4 : vector<1x16x16x4xbf16> to vector<256x4xbf16>
    %c0_3 = arith.constant 0 : index
    %c0_4 = arith.constant 0 : index
    %c0_5 = arith.constant 0 : index
    %c0_6 = arith.constant 0 : index
    %6 = vector.load %arg3[%c0_3, %c0_4, %c0_5, %c0_6] : memref<1x3x4x128xbf16, #tpu.memory_space<vmem>>, vector<1x1x4x128xbf16>
    %7 = vector.shape_cast %6 : vector<1x1x4x128xbf16> to vector<4x128xbf16>
    %cst = arith.constant dense<0.000000e+00> : vector<256x128xf32>
    %8 = tpu.matmul %5, %7, %cst {dimension_numbers = #tpu.dot_dimension_numbers<[1], [0], [0], [1], [0, 0, 1, 1], [], []>} : vector<256x4xbf16>, vector<4x128xbf16>, vector<256x128xf32> -> vector<256x128xf32>
    %c0_7 = arith.constant 0 : index
    %9 = arith.index_cast %arg1 : i32 to index
    %c1 = arith.constant 1 : index
    %c0_8 = arith.constant 0 : index
    %10 = vector.load %arg2[%c0_7, %9, %c1, %c0_8] : memref<1x18x18x4xbf16, #tpu.memory_space<vmem>>, vector<1x16x16x4xbf16>
    %11 = vector.shape_cast %10 : vector<1x16x16x4xbf16> to vector<256x4xbf16>
    %c0_9 = arith.constant 0 : index
    %c1_10 = arith.constant 1 : index
    %c0_11 = arith.constant 0 : index
    %c0_12 = arith.constant 0 : index
    %12 = vector.load %arg3[%c0_9, %c1_10, %c0_11, %c0_12] : memref<1x3x4x128xbf16, #tpu.memory_space<vmem>>, vector<1x1x4x128xbf16>
    %13 = vector.shape_cast %12 : vector<1x1x4x128xbf16> to vector<4x128xbf16>
    %cst_13 = arith.constant dense<0.000000e+00> : vector<256x128xf32>
    %14 = tpu.matmul %11, %13, %cst_13 {dimension_numbers = #tpu.dot_dimension_numbers<[1], [0], [0], [1], [0, 0, 1, 1], [], []>} : vector<256x4xbf16>, vector<4x128xbf16>, vector<256x128xf32> -> vector<256x128xf32>
    %15 = arith.addf %8, %14 : vector<256x128xf32>
    %c0_14 = arith.constant 0 : index
    %16 = arith.index_cast %arg1 : i32 to index
    %c2 = arith.constant 2 : index
    %c0_15 = arith.constant 0 : index
    %17 = vector.load %arg2[%c0_14, %16, %c2, %c0_15] : memref<1x18x18x4xbf16, #tpu.memory_space<vmem>>, vector<1x16x16x4xbf16>
    %18 = vector.shape_cast %17 : vector<1x16x16x4xbf16> to vector<256x4xbf16>
    %c0_16 = arith.constant 0 : index
    %c2_17 = arith.constant 2 : index
    %c0_18 = arith.constant 0 : index
    %c0_19 = arith.constant 0 : index
    %19 = vector.load %arg3[%c0_16, %c2_17, %c0_18, %c0_19] : memref<1x3x4x128xbf16, #tpu.memory_space<vmem>>, vector<1x1x4x128xbf16>
    %20 = vector.shape_cast %19 : vector<1x1x4x128xbf16> to vector<4x128xbf16>
    %cst_20 = arith.constant dense<0.000000e+00> : vector<256x128xf32>
    %21 = tpu.matmul %18, %20, %cst_20 {dimension_numbers = #tpu.dot_dimension_numbers<[1], [0], [0], [1], [0, 0, 1, 1], [], []>} : vector<256x4xbf16>, vector<4x128xbf16>, vector<256x128xf32> -> vector<256x128xf32>
    %22 = arith.addf %15, %21 : vector<256x128xf32>
    %c0_21 = arith.constant 0 : index
    %c0_22 = arith.constant 0 : index
    %23 = vector.load %arg7[%c0_21, %c0_22] : memref<256x128xf32, #tpu.memory_space<vmem>>, vector<256x128xf32>
    %24 = arith.addf %23, %22 : vector<256x128xf32>
    %c0_23 = arith.constant 0 : index
    %c0_24 = arith.constant 0 : index
    %25 = vector.load %arg7[%c0_23, %c0_24] : memref<256x128xf32, #tpu.memory_space<vmem>>, vector<256x128xf32>
    tpu.vector_store %arg7[%c0_23, %c0_24], %24 {strides = array<i32>} : memref<256x128xf32, #tpu.memory_space<vmem>>, vector<256x128xf32>,
    %c2_i32 = arith.constant 2 : i32
    %26 = arith.cmpi eq, %arg1, %c2_i32 : i32
    %27 = arith.extui %26 : i1 to i32
    %c0_i32_25 = arith.constant 0 : i32
    %28 = arith.cmpi ne, %27, %c0_i32_25 : i32
    scf.if %28 {
      %c0_26 = arith.constant 0 : index
      %c0_27 = arith.constant 0 : index
      %29 = vector.load %arg7[%c0_26, %c0_27] : memref<256x128xf32, #tpu.memory_space<vmem>>, vector<256x128xf32>
      %30 = arith.truncf %29 : vector<256x128xf32> to vector<256x128xbf16>
      %c0_28 = arith.constant 0 : index
      %c0_29 = arith.constant 0 : index
      %31 = vector.load %arg4[%c0_28, %c0_29] : memref<256x128xbf16, #tpu.memory_space<vmem>>, vector<256x128xbf16>
      tpu.vector_store %arg4[%c0_28, %c0_29], %30 {strides = array<i32>} : memref<256x128xbf16, #tpu.memory_space<vmem>>, vector<256x128xbf16>,
      %cst_30 = arith.constant dense<0.000000e+00> : vector<128xf32>
      %32 = vector.multi_reduction <add>, %29, %cst_30 [0] : vector<256x128xf32> to vector<128xf32>
      %33 = vector.shape_cast %32 : vector<128xf32> to vector<1x128xf32>
      %34 = vector.shape_cast %33 : vector<1x128xf32> to vector<1x1x128xf32>
      %c0_31 = arith.constant 0 : index
      %c0_32 = arith.constant 0 : index
      %c0_33 = arith.constant 0 : index
      %35 = vector.load %arg5[%c0_31, %c0_32, %c0_33] : memref<1x1x128xf32, #tpu.memory_space<vmem>>, vector<1x1x128xf32>
      tpu.vector_store %arg5[%c0_31, %c0_32, %c0_33], %34 {strides = array<i32>} : memref<1x1x128xf32, #tpu.memory_space<vmem>>, vector<1x1x128xf32>,
      %36 = arith.mulf %29, %29 : vector<256x128xf32>
      %cst_34 = arith.constant dense<0.000000e+00> : vector<128xf32>
      %37 = vector.multi_reduction <add>, %36, %cst_34 [0] : vector<256x128xf32> to vector<128xf32>
      %38 = vector.shape_cast %37 : vector<128xf32> to vector<1x128xf32>
      %39 = vector.shape_cast %38 : vector<1x128xf32> to vector<1x1x128xf32>
      %c0_35 = arith.constant 0 : index
      %c0_36 = arith.constant 0 : index
      %c0_37 = arith.constant 0 : index
      %40 = vector.load %arg6[%c0_35, %c0_36, %c0_37] : memref<1x1x128xf32, #tpu.memory_space<vmem>>, vector<1x1x128xf32>
      tpu.vector_store %arg6[%c0_35, %c0_36, %c0_37], %39 {strides = array<i32>} : memref<1x1x128xf32, #tpu.memory_space<vmem>>, vector<1x1x128xf32>,
    } else {
    }
    return
  }
  func.func @transform_0(%arg0: i32, %arg1: i32) -> (i32, i32, i32, i32) {
    %c0_i32 = arith.constant 0 : i32
    %c0_i32_0 = arith.constant 0 : i32
    %c0_i32_1 = arith.constant 0 : i32
    %c0_i32_2 = arith.constant 0 : i32
    return %arg0, %c0_i32, %c0_i32_0, %c0_i32_1 : i32, i32, i32, i32
  }
  func.func @transform_1(%arg0: i32, %arg1: i32) -> (i32, i32, i32, i32) {
    %c0_i32 = arith.constant 0 : i32
    %c0_i32_0 = arith.constant 0 : i32
    %c0_i32_1 = arith.constant 0 : i32
    %c0_i32_2 = arith.constant 0 : i32
    return %arg1, %c0_i32, %c0_i32_0, %c0_i32_1 : i32, i32, i32, i32
  }
  func.func @transform_2(%arg0: i32, %arg1: i32) -> (i32, i32) {
    %c0_i32 = arith.constant 0 : i32
    %c0_i32_0 = arith.constant 0 : i32
    return %arg0, %c0_i32 : i32, i32
  }
  func.func @transform_3(%arg0: i32, %arg1: i32) -> (i32, i32, i32) {
    %c0_i32 = arith.constant 0 : i32
    %c0_i32_0 = arith.constant 0 : i32
    %c0_i32_1 = arith.constant 0 : i32
    return %arg0, %c0_i32, %c0_i32_0 : i32, i32, i32
  }
  func.func @transform_4(%arg0: i32, %arg1: i32) -> (i32, i32, i32) {
    %c0_i32 = arith.constant 0 : i32
    %c0_i32_0 = arith.constant 0 : i32
    %c0_i32_1 = arith.constant 0 : i32
    return %arg0, %c0_i32, %c0_i32_0 : i32, i32, i32
  }
}

module attributes {stable_mosaic.version = 11 : i64} {
  func.func @_bn_relu_kernel(%arg0: i32, %arg1: memref<256x128xbf16, #tpu.memory_space<vmem>>, %arg2: memref<1x128xf32, #tpu.memory_space<vmem>>, %arg3: memref<1x128xf32, #tpu.memory_space<vmem>>, %arg4: memref<256x128xbf16, #tpu.memory_space<vmem>>) attributes {dimension_semantics = [#tpu.dimension_semantics<parallel>], iteration_bounds = array<i64: 2>, scalar_prefetch = 0 : i64, scratch_operands = 0 : i64, tpu.core_type = #tpu.core_type<tc>, window_params = [{transform_indices = @transform_0, window_bounds = array<i64: 256, 128>}, {pipeline_mode = #tpu.pipeline_mode<synchronous>, transform_indices = @transform_1, window_bounds = array<i64: 1, 128>}, {pipeline_mode = #tpu.pipeline_mode<synchronous>, transform_indices = @transform_2, window_bounds = array<i64: 1, 128>}, {transform_indices = @transform_3, window_bounds = array<i64: 256, 128>}]} {
    %c0 = arith.constant 0 : index
    %c0_0 = arith.constant 0 : index
    %0 = vector.load %arg1[%c0, %c0_0] : memref<256x128xbf16, #tpu.memory_space<vmem>>, vector<256x128xbf16>
    %1 = arith.extf %0 : vector<256x128xbf16> to vector<256x128xf32>
    %c0_1 = arith.constant 0 : index
    %c0_2 = arith.constant 0 : index
    %2 = vector.load %arg2[%c0_1, %c0_2] : memref<1x128xf32, #tpu.memory_space<vmem>>, vector<1x128xf32>
    %3 = vector.broadcast %2 : vector<1x128xf32> to vector<256x128xf32>
    %4 = arith.mulf %1, %3 : vector<256x128xf32>
    %c0_3 = arith.constant 0 : index
    %c0_4 = arith.constant 0 : index
    %5 = vector.load %arg3[%c0_3, %c0_4] : memref<1x128xf32, #tpu.memory_space<vmem>>, vector<1x128xf32>
    %6 = vector.broadcast %5 : vector<1x128xf32> to vector<256x128xf32>
    %7 = arith.addf %4, %6 : vector<256x128xf32>
    %cst = arith.constant 0.000000e+00 : f32
    %8 = vector.broadcast %cst : f32 to vector<256x128xf32>
    %9 = arith.maximumf %7, %8 : vector<256x128xf32>
    %10 = arith.truncf %9 : vector<256x128xf32> to vector<256x128xbf16>
    %c0_5 = arith.constant 0 : index
    %c0_6 = arith.constant 0 : index
    %11 = vector.load %arg4[%c0_5, %c0_6] : memref<256x128xbf16, #tpu.memory_space<vmem>>, vector<256x128xbf16>
    tpu.vector_store %arg4[%c0_5, %c0_6], %10 {strides = array<i32>} : memref<256x128xbf16, #tpu.memory_space<vmem>>, vector<256x128xbf16>,
    return
  }
  func.func @transform_0(%arg0: i32) -> (i32, i32) {
    %c0_i32 = arith.constant 0 : i32
    %c0_i32_0 = arith.constant 0 : i32
    return %arg0, %c0_i32 : i32, i32
  }
  func.func @transform_1(%arg0: i32) -> (i32, i32) {
    %c0_i32 = arith.constant 0 : i32
    %c0_i32_0 = arith.constant 0 : i32
    %c0_i32_1 = arith.constant 0 : i32
    return %c0_i32, %c0_i32_0 : i32, i32
  }
  func.func @transform_2(%arg0: i32) -> (i32, i32) {
    %c0_i32 = arith.constant 0 : i32
    %c0_i32_0 = arith.constant 0 : i32
    %c0_i32_1 = arith.constant 0 : i32
    return %c0_i32, %c0_i32_0 : i32, i32
  }
  func.func @transform_3(%arg0: i32) -> (i32, i32) {
    %c0_i32 = arith.constant 0 : i32
    %c0_i32_0 = arith.constant 0 : i32
    return %arg0, %c0_i32 : i32, i32
  }
}

</mosaic_0001>

<bundles_post_ra>
// kernel: tile.18
= control target key start
LH: loop header
LB: loop body
LE: loop exit
PB: predicated region body
PF: predicated region fallthrough
CT: control target
= control target key end

     0   :  { %s22_s0 = inlined_call_operand.vmem [shape: f32[32], index: 0, kind: input, shape index: {}]   ;;  %s23_s1 = inlined_call_operand.vmem [shape: f32[4,32], index: 1, kind: output, shape index: {}]  }
   0x1   :  { %v4_v0 = vld [vmem:[%s22_s0] ss:$0 sm:$0xff] }
   0x2   :  { %5 = vst [vmem:[%s23_s1] sm:$0xf] %v4_v0 }

// kernel: tile.19
= control target key start
LH: loop header
LB: loop body
LE: loop exit
PB: predicated region body
PF: predicated region fallthrough
CT: control target
= control target key end

     0   :  { %vm7_vm0 = vcmask 261120   ;;  %s37_s8 = smov 32   ;;  %s38_s9 = smov 64   ;;  %vm13_vm1 = vcmask 1048320   ;;  %vm19_vm2 = vcmask 785920   ;;  %vm25_vm3 = vcmask 523520   ;;  %s55_s0 = inlined_call_operand.vmem [shape: f32[4,32], index: 0, kind: input, shape index: {}]   ;;  %s56_s1 = inlined_call_operand.vmem [shape: f32[1,128], index: 1, kind: output, shape index: {}]  }
   0x1   :  { %v4_v0 = vld [vmem:[%s55_s0] sm:$0xf]  ;;  %s36_s0 = smov 96  }
   0x2   :  { %5 = vst [vmem:[#allocation1] sm:$0xf] %v4_v0 }
   0x9   :  { %v10_v1 = vld [vmem:[#allocation1 + $0x3] sm:$0x1]   ;;  %v22_v2 = vld [vmem:[#allocation1 + $0x1] sm:$0x1]   ;;  %v6_v3 = vld [vmem:[#allocation1] sm:$0x1]  }
   0xa   :  { %11 = vrot.lane.b32.xlu0 %v10_v1, %s36_s0  ;;  %23 = vrot.lane.b32.xlu1 %v22_v2, %s37_s8  ;;  %v16_v4 = vld [vmem:[#allocation1 + $0x2] sm:$0x1]   ;;  %8 = vst.msk [vmem:[#allocation0] sm:$0x1] %vm7_vm0, %v6_v3  }
   0xe   :  { %17 = vrot.lane.b32.xlu0 %v16_v4, %s38_s9 }
  0x7c   :  { %v12_v5 = vpop.permute.xlu0 %11   ;;  %v24_v6 = vpop.permute.xlu1 %23  }
  0x7d   :  { %14 = vst.msk [vmem:[#allocation0] sm:$0x1] %vm13_vm1, %v12_v5  }
  0x80   :  { %v18_v7 = vpop.permute.xlu0 %17  }
  0x81   :  { %20 = vst.msk [vmem:[#allocation0] sm:$0x1] %vm19_vm2, %v18_v7  }
  0x82   :  { %26 = vst.msk [vmem:[#allocation0] sm:$0x1] %vm25_vm3, %v24_v6  }
  0x89   :  { %v30_v8 = vld [vmem:[#allocation0] sm:$0x1] }
  0x8a   :  { %32 = vst [vmem:[%s56_s1] sm:$0x1] %v30_v8 }

</bundles_post_ra>
